<compile_context>
chip_gen: v7x
topology: tpu7x:2x2x1
jax: 0.10.0
libtpu: 0.0.40
codegen_flags: <defaults>
</compile_context>

<pallas_src>
import functools

import jax
import jax.numpy as jnp
from jax import lax
from jax.experimental import pallas as pl
from jax.experimental.pallas import tpu as pltpu

_SUPPORTED_ACTIVATIONS = ("relu", "lrelu", "tanh", "selu", "none")


def _round_up(x, m):
    return (x + m - 1) // m * m


def _ceil_div(a, b):
    return -(-a // b)


def _apply_activation(y, activation):
    if activation == "relu":
        return jnp.maximum(y, 0.0)
    if activation == "lrelu":
        return jnp.maximum(y, 0.2 * y)  # LinearBlock uses nn.LeakyReLU(0.2)
    if activation == "tanh":
        return jnp.tanh(y)
    if activation == "selu":
        alpha = 1.6732632423543772
        scale = 1.0507009873554805
        return scale * jnp.where(y > 0.0, y, alpha * (jnp.exp(y) - 1.0))
    return y  # "none"


# ---------------------------------------------------------------------------
# Kernel: tiled matmul + fused bias + activation.
#   grid = (M tiles, N tiles, K tiles); K is last ("arbitrary"); the f32 output
#   block is resident across K and used directly as the accumulator.
#   x_ref: (tm, tk)  w_ref: (tn, tk)  b_ref: (1, tn)  o_ref: (tm, tn) f32
# ---------------------------------------------------------------------------
def _linear_block_kernel(x_ref, w_ref, b_ref, o_ref, *, activation, single_k_step):
    dot = lax.dot_general(
        x_ref[...],
        w_ref[...],
        dimension_numbers=(((1,), (1,)), ((), ())),  # contract K with K (W.T)
        preferred_element_type=jnp.float32,
    )

    if single_k_step:
        o_ref[...] = _apply_activation(dot + b_ref[...], activation)
        return

    k = pl.program_id(2)

    @pl.when(k == 0)
    def _():
        o_ref[...] = jnp.zeros_like(o_ref)

    o_ref[...] += dot

    @pl.when(k == pl.num_programs(2) - 1)
    def _():
        o_ref[...] = _apply_activation(o_ref[...] + b_ref[...], activation)


# ---------------------------------------------------------------------------
# Generation-aware VMEM budget and tile selection.
# ---------------------------------------------------------------------------
def _vmem_capacity_bytes():
    try:
        return int(pltpu.get_tpu_info().vmem_capacity_bytes)
    except Exception:
        return 64 * 1024 * 1024  # conservative: v7x per-TensorCore VMEM


def _working_set_bytes(tm, tn, tk, in_esize):
    # double-buffered x & W tiles + double-buffered bias + f32 output block (x2)
    return 2 * (tm * tk + tn * tk) * in_esize + 2 * tn * 4 + 2 * tm * tn * 4


def _select_tiles(M, N, K, in_esize, row_align, budget):
    Mp = _round_up(M, row_align)
    Np = _round_up(N, 128)
    Kp = _round_up(K, 128)

    def fits(tm, tn, tk):
        return _working_set_bytes(tm, tn, tk, in_esize) <= budget

    if Mp <= 256:
        # Small-M fast path: stream W once (full K), big lane-dense N tiles.
        tm = Mp
        tk = Kp
        # Prefer >= 2 N tiles so both v7x TensorCores get work.
        tn = Np if Np <= 128 else _round_up(_ceil_div(Np, 2), 128)
        while not fits(tm, tn, tk) and tn > 512:
            tn = _round_up(_ceil_div(tn, 2), 128)
        while not fits(tm, tn, tk) and tk > 512:
            tk = _round_up(_ceil_div(tk, 2), 128)
        while not fits(tm, tn, tk) and tn > 128:
            tn = _round_up(_ceil_div(tn, 2), 128)
        return tm, tn, tk

    # Large-M path: 256-aligned MXU-shaped tiles, biggest that fit the budget.
    candidates = (
        (1024, 1024, 1024), (512, 1024, 1024), (512, 1024, 512),
        (512, 512, 1024), (512, 512, 512), (256, 512, 512),
        (256, 256, 512), (256, 256, 256), (128, 256, 256),
        (128, 128, 256), (128, 128, 128),
    )
    for tm_c, tn_c, tk_c in candidates:
        tm = min(tm_c, _round_up(Mp, 256))
        tn = min(tn_c, Np)
        tk = min(tk_c, Kp)
        if fits(tm, tn, tk):
            return tm, tn, tk
    return min(128, _round_up(Mp, 128)), min(128, Np), min(128, Kp)


# ---------------------------------------------------------------------------
# Wrapper.
#   x:      (M, K)   activations (f32)
#   weight: (N, K)   PyTorch nn.Linear layout (out_features, in_features)
#   bias:   (N,)
#   precision: "bf16" (MXU-native operands, f32 accumulation; fast) or
#              "f32"  (exact nn.Linear numerics).
# ---------------------------------------------------------------------------
def linear_block_forward(x, weight, bias, *, activation="relu", precision="bf16"):
    if activation not in _SUPPORTED_ACTIVATIONS:
        raise ValueError(f"unsupported activation: {activation}")
    if precision not in ("bf16", "f32"):
        raise ValueError(f"unsupported precision: {precision}")

    M, K = x.shape
    N, K2 = weight.shape
    assert K == K2 and bias.shape == (N,)

    op_dtype = jnp.bfloat16 if precision == "bf16" else jnp.float32
    in_esize = 2 if precision == "bf16" else 4
    row_align = 16 if precision == "bf16" else 8

    vmem_cap = _vmem_capacity_bytes()
    vmem_limit = max(32 * 1024 * 1024, min(vmem_cap - (16 << 20), 96 << 20))
    tile_budget = int(vmem_limit * 0.85)

    tm, tn, tk = _select_tiles(M, N, K, in_esize, row_align, tile_budget)
    Mp, Np, Kp = _round_up(M, tm), _round_up(N, tn), _round_up(K, tk)

    # Zero padding along K contributes nothing to the dot product; padded
    # rows/cols of M/N are sliced off below.  No weight transpose here.
    xp = jnp.pad(x, ((0, Mp - M), (0, Kp - K))).astype(op_dtype)
    wp = jnp.pad(weight, ((0, Np - N), (0, Kp - K))).astype(op_dtype)
    bp = jnp.pad(bias, (0, Np - N)).astype(jnp.float32).reshape(1, Np)

    n_m, n_n, n_k = Mp // tm, Np // tn, Kp // tk
    grid = (n_m, n_n, n_k)

    kernel = functools.partial(
        _linear_block_kernel, activation=activation, single_k_step=(n_k == 1)
    )

    out = pl.pallas_call(
        kernel,
        out_shape=jax.ShapeDtypeStruct((Mp, Np), jnp.float32),
        grid_spec=pltpu.PrefetchScalarGridSpec(
            num_scalar_prefetch=0,
            grid=grid,
            in_specs=[
                pl.BlockSpec((tm, tk), lambda i, j, k: (i, k)),   # x
                pl.BlockSpec((tn, tk), lambda i, j, k: (j, k)),   # W (N, K) layout
                pl.BlockSpec((1, tn), lambda i, j, k: (0, j)),    # bias
            ],
            out_specs=pl.BlockSpec((tm, tn), lambda i, j, k: (i, j)),
        ),
        compiler_params=pltpu.CompilerParams(
            dimension_semantics=("parallel", "parallel", "arbitrary"),
            vmem_limit_bytes=vmem_limit,
        ),
        cost_estimate=pl.CostEstimate(
            flops=2 * Mp * Np * Kp,
            transcendentals=Mp * Np if activation in ("tanh", "selu") else 0,
            bytes_accessed=in_esize * (Mp * Kp * n_n + Np * Kp * n_m)
            + 4 * (Mp * Np + Np),
        ),
    )(xp, wp, bp)

    return out[:M, :N].astype(x.dtype)


# ---------------------------------------------------------------------------
# Main: deterministic small example (LinearBlock(input_dim=256, output_dim=128),
# default norm='none', activation='relu'), batch of 8.
# ---------------------------------------------------------------------------
if __name__ == "__main__":
    batch, input_dim, output_dim = 8, 256, 128

    key = jax.random.PRNGKey(0)
    kx, kw, kb = jax.random.split(key, 3)
    x = jax.random.normal(kx, (batch, input_dim), jnp.float32)
    weight = jax.random.normal(kw, (output_dim, input_dim), jnp.float32) / jnp.sqrt(
        float(input_dim)
    )
    bias = jax.random.normal(kb, (output_dim,), jnp.float32) * 0.01

    ref = jnp.maximum(x @ weight.T + bias, 0.0)

    # Fast path: bf16 MXU operands, f32 accumulation.
    fwd_bf16 = jax.jit(
        functools.partial(linear_block_forward, activation="relu", precision="bf16")
    )
    out_bf16 = fwd_bf16(x, weight, bias)
    jax.block_until_ready(out_bf16)
    assert out_bf16.shape == (batch, output_dim) and out_bf16.dtype == jnp.float32
    assert jnp.allclose(out_bf16, ref, atol=5e-2, rtol=5e-2)

    # Exact path: f32 operands reproduce nn.Linear numerics.
    fwd_f32 = jax.jit(
        functools.partial(linear_block_forward, activation="relu", precision="f32")
    )
    out_f32 = fwd_f32(x, weight, bias)
    jax.block_until_ready(out_f32)
    assert out_f32.shape == (batch, output_dim)
    assert jnp.allclose(out_f32, ref, atol=1e-4, rtol=1e-4)

    print("KERNEL_OK")
</pallas_src>

<mosaic_0001>
module attributes {stable_mosaic.version = 11 : i64} {
  func.func @_linear_block_kernel(%arg0: i32, %arg1: i32, %arg2: i32, %arg3: memref<16x256xbf16, #tpu.memory_space<vmem>>, %arg4: memref<128x256xbf16, #tpu.memory_space<vmem>>, %arg5: memref<1x128xf32, #tpu.memory_space<vmem>>, %arg6: memref<16x128xf32, #tpu.memory_space<vmem>>) attributes {dimension_semantics = [#tpu.dimension_semantics<parallel>, #tpu.dimension_semantics<parallel>, #tpu.dimension_semantics<arbitrary>], iteration_bounds = array<i64: 1, 1, 1>, scalar_prefetch = 0 : i64, scratch_operands = 0 : i64, tpu.core_type = #tpu.core_type<tc>, window_params = [{transform_indices = @transform_0, window_bounds = array<i64: 16, 256>}, {transform_indices = @transform_1, window_bounds = array<i64: 128, 256>}, {transform_indices = @transform_2, window_bounds = array<i64: 1, 128>}, {transform_indices = @transform_3, window_bounds = array<i64: 16, 128>}]} {
    %c0 = arith.constant 0 : index
    %c0_0 = arith.constant 0 : index
    %0 = vector.load %arg3[%c0, %c0_0] : memref<16x256xbf16, #tpu.memory_space<vmem>>, vector<16x256xbf16>
    %c0_1 = arith.constant 0 : index
    %c0_2 = arith.constant 0 : index
    %1 = vector.load %arg4[%c0_1, %c0_2] : memref<128x256xbf16, #tpu.memory_space<vmem>>, vector<128x256xbf16>
    %cst = arith.constant dense<0.000000e+00> : vector<16x128xf32>
    %2 = tpu.matmul %0, %1, %cst {dimension_numbers = #tpu.dot_dimension_numbers<[1], [1], [0], [0], [0, 0, 1, 0], [], []>} : vector<16x256xbf16>, vector<128x256xbf16>, vector<16x128xf32> -> vector<16x128xf32>
    %c0_3 = arith.constant 0 : index
    %c0_4 = arith.constant 0 : index
    %3 = vector.load %arg5[%c0_3, %c0_4] : memref<1x128xf32, #tpu.memory_space<vmem>>, vector<1x128xf32>
    %4 = vector.broadcast %3 : vector<1x128xf32> to vector<16x128xf32>
    %5 = arith.addf %2, %4 : vector<16x128xf32>
    %cst_5 = arith.constant 0.000000e+00 : f32
    %6 = vector.broadcast %cst_5 : f32 to vector<16x128xf32>
    %7 = arith.maximumf %5, %6 : vector<16x128xf32>
    %c0_6 = arith.constant 0 : index
    %c0_7 = arith.constant 0 : index
    %8 = vector.load %arg6[%c0_6, %c0_7] : memref<16x128xf32, #tpu.memory_space<vmem>>, vector<16x128xf32>
    tpu.vector_store %arg6[%c0_6, %c0_7], %7 {strides = array<i32>} : memref<16x128xf32, #tpu.memory_space<vmem>>, vector<16x128xf32>,
    return
  }
  func.func @transform_0(%arg0: i32, %arg1: i32, %arg2: i32) -> (i32, i32) {
    %c0_i32 = arith.constant 0 : i32
    return %arg0, %arg2 : i32, i32
  }
  func.func @transform_1(%arg0: i32, %arg1: i32, %arg2: i32) -> (i32, i32) {
    %c0_i32 = arith.constant 0 : i32
    return %arg1, %arg2 : i32, i32
  }
  func.func @transform_2(%arg0: i32, %arg1: i32, %arg2: i32) -> (i32, i32) {
    %c0_i32 = arith.constant 0 : i32
    %c0_i32_0 = arith.constant 0 : i32
    return %c0_i32, %arg1 : i32, i32
  }
  func.func @transform_3(%arg0: i32, %arg1: i32, %arg2: i32) -> (i32, i32) {
    %c0_i32 = arith.constant 0 : i32
    return %arg0, %arg1 : i32, i32
  }
}

</mosaic_0001>

<bundles_post_ra>
// kernel: linear_block_forward.1
= control target key start
LH: loop header
LB: loop body
LE: loop exit
PB: predicated region body
PF: predicated region fallthrough
CT: control target
= control target key end

     0   :  { %s308_s1 = inlined_call_operand.vmem [shape: bf16[128,256], index: 1, kind: input, shape index: {}]   ;;  %s309_s0 = inlined_call_operand.vmem [shape: bf16[16,256], index: 0, kind: input, shape index: {}]   ;;  %s310_s2 = inlined_call_operand.vmem [shape: f32[1,128], index: 2, kind: input, shape index: {}]   ;;  %s311_s3 = inlined_call_operand.vmem [shape: f32[16,128], index: 3, kind: output, shape index: {}]  }
   0x1   :  { %v198_v0 = vld [vmem:[%s308_s1 + $0x4] ss:$8 sps:$4 sm:$0xff]   ;;  %v200_v1 = vld [vmem:[%s308_s1] ss:$8 sps:$4 sm:$0xff]   ;;  %v201_v2 = vld [vmem:[%s308_s1 + $0x14] ss:$8 sps:$4 sm:$0xff]  }
   0x2   :  { %130 = vmatprep.subr.bf16.mxu0 %v198_v0  ;;  %v203_v3 = vld [vmem:[%s308_s1 + $0x10] ss:$8 sps:$4 sm:$0xff]   ;;  %v204_v4 = vld [vmem:[%s308_s1 + $0x24] ss:$8 sps:$4 sm:$0xff]   ;;  %v206_v6 = vld [vmem:[%s308_s1 + $0x20] ss:$8 sps:$4 sm:$0xff]  }
   0x3   :  { %131 = vmatpush1.bf16.xpose.msra.mxu0 %v200_v1  ;;  %v224_v5 = vld [vmem:[%s309_s0 + $0x4] ss:$8 sps:$4 sm:$0xff]   ;;  %v207_v7 = vld [vmem:[%s308_s1 + $0x34] ss:$8 sps:$4 sm:$0xff]   ;;  %v209_v8 = vld [vmem:[%s308_s1 + $0x30] ss:$8 sps:$4 sm:$0xff]  }
   0x4   :  { %132 = vmatprep.subr.bf16.mxu0 %v201_v2  ;;  %162 = vmatprep.mubr.bf16.mxu0 %v224_v5  ;;  %v210_v9 = vld [vmem:[%s308_s1 + $0x44] ss:$8 sps:$4 sm:$0xff]   ;;  %v212_v10 = vld [vmem:[%s308_s1 + $0x40] ss:$8 sps:$4 sm:$0xff]   ;;  %v213_v11 = vld [vmem:[%s308_s1 + $0x54] ss:$8 sps:$4 sm:$0xff]  }
   0x5   :  { %v215_v12 = vld [vmem:[%s308_s1 + $0x50] ss:$8 sps:$4 sm:$0xff]   ;;  %v216_v13 = vld [vmem:[%s308_s1 + $0x64] ss:$8 sps:$4 sm:$0xff]   ;;  %v218_v14 = vld [vmem:[%s308_s1 + $0x60] ss:$8 sps:$4 sm:$0xff]  }
   0x6   :  { %v219_v15 = vld [vmem:[%s308_s1 + $0x74] ss:$8 sps:$4 sm:$0xff]   ;;  %v221_v16 = vld [vmem:[%s308_s1 + $0x70] ss:$8 sps:$4 sm:$0xff]   ;;  %v222_v17 = vld [vmem:[%s309_s0] ss:$8 sps:$4 sm:$0xff]  }
   0x7   :  { %v179_v18 = vld [vmem:[%s310_s2] ss:$0 sm:$0xff] }
   0xb   :  { %133 = vmatpush1.bf16.xpose.msra.mxu0 %v203_v3 }
   0xc   :  { %134 = vmatprep.subr.bf16.mxu0 %v204_v4 }
  0x13   :  { %135 = vmatpush1.bf16.xpose.msra.mxu0 %v206_v6 }
  0x14   :  { %136 = vmatprep.subr.bf16.mxu0 %v207_v7 }
  0x1b   :  { %137 = vmatpush1.bf16.xpose.msra.mxu0 %v209_v8 }
  0x1c   :  { %138 = vmatprep.subr.bf16.mxu0 %v210_v9 }
  0x23   :  { %139 = vmatpush1.bf16.xpose.msra.mxu0 %v212_v10 }
  0x24   :  { %140 = vmatprep.subr.bf16.mxu0 %v213_v11 }
  0x2b   :  { %141 = vmatpush1.bf16.xpose.msra.mxu0 %v215_v12 }
  0x2c   :  { %142 = vmatprep.subr.bf16.mxu0 %v216_v13 }
  0x33   :  { %143 = vmatpush1.bf16.xpose.msra.mxu0 %v218_v14 }
  0x34   :  { %144 = vmatprep.subr.bf16.mxu0 %v219_v15 }
  0x3b   :  { %145 = vmatpush1.bf16.xpose.msra.mxu0 %v221_v16 }
  0x42   :  { %163 = vmatmul.mubr.bf16.vlgmr.msra.gmra.mrb[0].mxu0 %v222_v17 }
 0x115   :  { %v164_v19 = vpop.f32.mrb[0].mxu0 }
 0x116   :  { %v165_v20 = vadd.f32 %v179_v18, %v164_v19  ;;  %v166_v21 = vpop.f32.mrb[1].mxu0 }
 0x117   :  { %v167_v22 = vpop.f32.mrb[2].mxu0 }
 0x118   :  { %v171_v23 = vmax.f32 %v165_v20, 0.0  ;;  %v168_v24 = vadd.f32 %v179_v18, %v167_v22  ;;  %v169_v25 = vpop.f32.mrb[3].mxu0 }
 0x11a   :  { %173 = vst [vmem:[%s311_s3] sm:$0xff] %v171_v23  ;;  %v172_v26 = vmax.f32 %v168_v24, 0.0 }
 0x11c   :  { %174 = vst [vmem:[%s311_s3 + $0x8] sm:$0xff] %v172_v26 }

</bundles_post_ra>
